<compile_context>
chip_gen: v5e
topology: v5e:2x2
jax: 0.10.0
libtpu: 0.0.40
codegen_flags: <defaults>
</compile_context>

<pallas_src>
import functools
from typing import NamedTuple

import jax
import jax.numpy as jnp
from jax import lax
from jax.experimental import pallas as pl
from jax.experimental.pallas import tpu as pltpu

LN_EPS = 1e-5          # torch.nn.LayerNorm default eps
LANE = 128             # lane width
ROW_TILE = 16          # bf16 output packs 2 sublanes -> keep block rows % 16 == 0


class ActorDims(NamedTuple):
    num_states: int
    l1: int
    l2: int
    num_actions: int


def _round_up(x, m):
    return (x + m - 1) // m * m


def _layernorm(h, gamma, beta, inv_n):
    # LayerNorm over the (possibly lane-padded) last dim.  Padded lanes hold
    # exact zeros, so sums over the padded width equal sums over the true
    # width; dividing by the true feature count (inv_n) keeps the statistics
    # identical to torch's LayerNorm (biased variance).  One-pass variance
    # (E[x^2] - mu^2), clamped at 0 against round-off before rsqrt (EUP).
    s1 = jnp.sum(h, axis=-1, keepdims=True) * inv_n
    s2 = jnp.sum(h * h, axis=-1, keepdims=True) * inv_n
    var = jnp.maximum(s2 - s1 * s1, 0.0)
    return (h - s1) * lax.rsqrt(var + LN_EPS) * gamma + beta


def actor_net_kernel(x_ref,
                     w1_ref, ln1_ref,
                     w2_ref, ln2_ref,
                     w3_ref, b3_ref,
                     out_ref, *, inv_l1, inv_l2):
    # ln{1,2}_ref rows: [0]=linear bias, [1]=LN gamma, [2]=LN beta
    # (all zero-padded beyond the true width so padded lanes stay exactly 0).
    x = x_ref[...].astype(jnp.bfloat16)      # in-kernel cast: no wrapper op

    ln1 = ln1_ref[...]                        # single hoisted loads
    ln2 = ln2_ref[...]
    b3 = b3_ref[...]

    # FC1 -> LayerNorm -> ReLU  (bf16 MXU inputs, f32 accumulation)
    h = jnp.dot(x, w1_ref[...], preferred_element_type=jnp.float32)
    h = h + ln1[0:1, :]
    h = _layernorm(h, ln1[1:2, :], ln1[2:3, :], inv_l1)
    h = jnp.maximum(h, 0.0)

    # FC2 -> LayerNorm -> ReLU
    h = jnp.dot(h.astype(jnp.bfloat16), w2_ref[...],
                preferred_element_type=jnp.float32)
    h = h + ln2[0:1, :]
    h = _layernorm(h, ln2[1:2, :], ln2[2:3, :], inv_l2)
    h = jnp.maximum(h, 0.0)

    # mu -> tanh; lane-dense bf16 store (padded output columns are exactly 0).
    h = jnp.dot(h.astype(jnp.bfloat16), w3_ref[...],
                preferred_element_type=jnp.float32)
    out_ref[...] = jnp.tanh(h + b3).astype(out_ref.dtype)


def pack_actor_params(params):
    """One-time packing of raw f32 params into the kernel layout.

    Call once (after init / checkpoint load) and reuse for every forward —
    all casts / pads / concatenations are hoisted out of the per-call path.
    Weights are stored transposed (in_features, out_features), hidden and
    output dims zero-padded to multiples of 128, matmul operands in bf16.
    """
    num_states, l1 = params["w1"].shape
    l2 = params["w2"].shape[1]
    num_actions = params["w3"].shape[1]
    l1p = _round_up(l1, LANE)
    l2p = _round_up(l2, LANE)
    op = _round_up(num_actions, LANE)

    def pad_to(a, rows, cols):
        return jnp.pad(a, ((0, rows - a.shape[0]), (0, cols - a.shape[1])))

    ln1 = jnp.concatenate([params["b1"], params["g1"], params["be1"]], axis=0)
    ln2 = jnp.concatenate([params["b2"], params["g2"], params["be2"]], axis=0)

    packed = {
        "w1": pad_to(params["w1"], num_states, l1p).astype(jnp.bfloat16),
        "ln1": pad_to(ln1, 3, l1p).astype(jnp.float32),
        "w2": pad_to(params["w2"], l1p, l2p).astype(jnp.bfloat16),
        "ln2": pad_to(ln2, 3, l2p).astype(jnp.float32),
        "w3": pad_to(params["w3"], l2p, op).astype(jnp.bfloat16),
        "b3": pad_to(params["b3"], 1, op).astype(jnp.float32),
    }
    dims = ActorDims(num_states=num_states, l1=l1, l2=l2,
                     num_actions=num_actions)
    return packed, dims


def actor_net_forward(state, packed, dims, *, batch_tile=512):
    """state: (B, num_states) f32.  packed/dims: from pack_actor_params.

    batch_tile is an upper bound on rows per grid step (sweet spot 512-1024
    on v6e); the actual tile adapts to B so small batches are not inflated.
    """
    B, S = state.shape
    assert S == dims.num_states

    l1p = packed["w1"].shape[1]
    l2p = packed["w2"].shape[1]
    op = packed["w3"].shape[1]

    # Adaptive batch tiling.  For B >= 256 force >= 2 blocks so the parallel
    # grid axis shards across the two v7x TensorCores.
    n_blocks = max(1, -(-B // batch_tile))
    if B >= 2 * LANE:
        n_blocks = max(n_blocks, 2)
    bt = _round_up(-(-B // n_blocks), ROW_TILE)
    B_pad = _round_up(B, bt)
    grid = (B_pad // bt,)

    x = state
    if B_pad != B:
        # Zero rows: LN sees var=0 -> rsqrt(eps) is finite; rows sliced off.
        x = jnp.pad(x, ((0, B_pad - B), (0, 0)))

    kernel = functools.partial(actor_net_kernel,
                               inv_l1=1.0 / dims.l1, inv_l2=1.0 / dims.l2)
    rep = lambda i: (0, 0)

    flops = 2 * B_pad * (S * l1p + l1p * l2p + l2p * op)
    transcendentals = B_pad * (2 + op)          # 2 rsqrt per row + tanh per out elem
    param_bytes = (packed["w1"].size * 2 + packed["w2"].size * 2
                   + packed["w3"].size * 2
                   + (packed["ln1"].size + packed["ln2"].size
                      + packed["b3"].size) * 4)
    bytes_accessed = x.size * x.dtype.itemsize + param_bytes + B_pad * op * 2

    # VMEM budget: double-buffered blocks + f32 activation temporaries.
    est = 2 * (bt * S * 4 + bt * op * 2 + param_bytes) \
        + 4 * bt * max(l1p, l2p, op) * 4
    vmem_limit = int(min(max(2 * est, 16 * 1024 * 1024), 64 * 1024 * 1024))

    out = pl.pallas_call(
        kernel,
        out_shape=jax.ShapeDtypeStruct((B_pad, op), jnp.bfloat16),
        grid_spec=pltpu.PrefetchScalarGridSpec(
            num_scalar_prefetch=0,
            grid=grid,
            in_specs=[
                pl.BlockSpec((bt, S), lambda i: (i, 0)),
                pl.BlockSpec((S, l1p), rep),
                pl.BlockSpec((3, l1p), rep),
                pl.BlockSpec((l1p, l2p), rep),
                pl.BlockSpec((3, l2p), rep),
                pl.BlockSpec((l2p, op), rep),
                pl.BlockSpec((1, op), rep),
            ],
            out_specs=pl.BlockSpec((bt, op), lambda i: (i, 0)),
        ),
        compiler_params=pltpu.CompilerParams(
            dimension_semantics=("parallel",),
            vmem_limit_bytes=vmem_limit),
        cost_estimate=pl.CostEstimate(
            flops=flops,
            transcendentals=transcendentals,
            bytes_accessed=bytes_accessed),
    )(x, packed["w1"], packed["ln1"], packed["w2"], packed["ln2"],
      packed["w3"], packed["b3"])

    # Only the tiny useful slice is upcast back to f32 outside the kernel.
    return out[:B, :dims.num_actions].astype(jnp.float32)


def init_actor_params(key, num_states, num_actions, l1_dim, l2_dim):
    """Deterministic init mirroring the module's uniform init bounds.
    Weights stored transposed: (in_features, out_features), all f32."""
    k = jax.random.split(key, 6)
    f1 = 1.0 / jnp.sqrt(l1_dim)
    f2 = 1.0 / jnp.sqrt(l1_dim)
    f3 = 0.003
    u = lambda kk, shape, b: jax.random.uniform(kk, shape, jnp.float32, -b, b)
    return {
        "w1": u(k[0], (num_states, l1_dim), f1),
        "b1": u(k[1], (1, l1_dim), f1),
        "g1": jnp.ones((1, l1_dim), jnp.float32),
        "be1": jnp.zeros((1, l1_dim), jnp.float32),
        "w2": u(k[2], (l1_dim, l2_dim), f2),
        "b2": u(k[3], (1, l2_dim), f2),
        "g2": jnp.ones((1, l2_dim), jnp.float32),
        "be2": jnp.zeros((1, l2_dim), jnp.float32),
        "w3": u(k[4], (l2_dim, num_actions), f3),
        "b3": u(k[5], (1, num_actions), f3),
    }


def actor_net_ref(state, p):
    """Pure-JAX reference with numerics matching the kernel (bf16 matmul
    inputs, f32 accumulation, one-pass LN variance, bf16-rounded output)."""
    bf = jnp.bfloat16

    def ln(h, g, b):
        mu = jnp.mean(h, axis=-1, keepdims=True)
        var = jnp.maximum(jnp.mean(h * h, axis=-1, keepdims=True) - mu * mu, 0.0)
        return (h - mu) * lax.rsqrt(var + LN_EPS) * g + b

    h = jnp.dot(state.astype(bf), p["w1"].astype(bf),
                preferred_element_type=jnp.float32) + p["b1"]
    h = jax.nn.relu(ln(h, p["g1"], p["be1"]))
    h = jnp.dot(h.astype(bf), p["w2"].astype(bf),
                preferred_element_type=jnp.float32) + p["b2"]
    h = jax.nn.relu(ln(h, p["g2"], p["be2"]))
    h = jnp.dot(h.astype(bf), p["w3"].astype(bf),
                preferred_element_type=jnp.float32) + p["b3"]
    return jnp.tanh(h).astype(bf).astype(jnp.float32)


if __name__ == "__main__":
    key = jax.random.PRNGKey(0)
    kx, kx2, kp = jax.random.split(key, 3)

    batch = 8
    num_states = 32
    l1_dim = 64
    l2_dim = 64
    num_actions = 8

    params = init_actor_params(kp, num_states, num_actions, l1_dim, l2_dim)
    packed, dims = pack_actor_params(params)   # one-time packing (hoisted)

    fwd = jax.jit(actor_net_forward, static_argnames=("dims", "batch_tile"))

    # Small-batch (common DDPG actor case): no inflation to 256 anymore.
    state = jax.random.normal(kx, (batch, num_states), jnp.float32)
    out = jax.block_until_ready(fwd(state, packed, dims=dims))
    ref = actor_net_ref(state, params)
    assert out.shape == (batch, num_actions)
    assert jnp.allclose(out, ref, atol=5e-3, rtol=5e-2), "mismatch (B=8)"

    # Larger batch: exercises batch padding and the >=2-block parallel grid.
    state2 = jax.random.normal(kx2, (300, num_states), jnp.float32)
    out2 = jax.block_until_ready(fwd(state2, packed, dims=dims))
    ref2 = actor_net_ref(state2, params)
    assert out2.shape == (300, num_actions)
    assert jnp.allclose(out2, ref2, atol=5e-3, rtol=5e-2), "mismatch (B=300)"

    # TODO(synk): checkpoint save/load and the Adam optimizer from the module
    # are training-infra, not part of the forward pass, and are not kernels.
    print("KERNEL_OK")
</pallas_src>

<mosaic_0001>
module attributes {stable_mosaic.version = 11 : i64} {
  func.func @actor_net_kernel(%arg0: i32, %arg1: memref<16x32xf32, #tpu.memory_space<vmem>>, %arg2: memref<32x128xbf16, #tpu.memory_space<vmem>>, %arg3: memref<3x128xf32, #tpu.memory_space<vmem>>, %arg4: memref<128x128xbf16, #tpu.memory_space<vmem>>, %arg5: memref<3x128xf32, #tpu.memory_space<vmem>>, %arg6: memref<128x128xbf16, #tpu.memory_space<vmem>>, %arg7: memref<1x128xf32, #tpu.memory_space<vmem>>, %arg8: memref<16x128xbf16, #tpu.memory_space<vmem>>) attributes {dimension_semantics = [#tpu.dimension_semantics<parallel>], iteration_bounds = array<i64: 1>, scalar_prefetch = 0 : i64, scratch_operands = 0 : i64, tpu.core_type = #tpu.core_type<tc>, window_params = [{transform_indices = @transform_0, window_bounds = array<i64: 16, 32>}, {pipeline_mode = #tpu.pipeline_mode<synchronous>, transform_indices = @transform_1, window_bounds = array<i64: 32, 128>}, {pipeline_mode = #tpu.pipeline_mode<synchronous>, transform_indices = @transform_2, window_bounds = array<i64: 3, 128>}, {pipeline_mode = #tpu.pipeline_mode<synchronous>, transform_indices = @transform_3, window_bounds = array<i64: 128, 128>}, {pipeline_mode = #tpu.pipeline_mode<synchronous>, transform_indices = @transform_4, window_bounds = array<i64: 3, 128>}, {pipeline_mode = #tpu.pipeline_mode<synchronous>, transform_indices = @transform_5, window_bounds = array<i64: 128, 128>}, {pipeline_mode = #tpu.pipeline_mode<synchronous>, transform_indices = @transform_6, window_bounds = array<i64: 1, 128>}, {transform_indices = @transform_7, window_bounds = array<i64: 16, 128>}]} {
    %c0 = arith.constant 0 : index
    %c0_0 = arith.constant 0 : index
    %0 = vector.load %arg1[%c0, %c0_0] : memref<16x32xf32, #tpu.memory_space<vmem>>, vector<16x32xf32>
    %1 = arith.truncf %0 : vector<16x32xf32> to vector<16x32xbf16>
    %c0_1 = arith.constant 0 : index
    %c0_2 = arith.constant 0 : index
    %2 = vector.load %arg3[%c0_1, %c0_2] : memref<3x128xf32, #tpu.memory_space<vmem>>, vector<3x128xf32>
    %c0_3 = arith.constant 0 : index
    %c0_4 = arith.constant 0 : index
    %3 = vector.load %arg5[%c0_3, %c0_4] : memref<3x128xf32, #tpu.memory_space<vmem>>, vector<3x128xf32>
    %c0_5 = arith.constant 0 : index
    %c0_6 = arith.constant 0 : index
    %4 = vector.load %arg7[%c0_5, %c0_6] : memref<1x128xf32, #tpu.memory_space<vmem>>, vector<1x128xf32>
    %c0_7 = arith.constant 0 : index
    %c0_8 = arith.constant 0 : index
    %5 = vector.load %arg2[%c0_7, %c0_8] : memref<32x128xbf16, #tpu.memory_space<vmem>>, vector<32x128xbf16>
    %cst = arith.constant dense<0.000000e+00> : vector<16x128xf32>
    %6 = tpu.matmul %1, %5, %cst {dimension_numbers = #tpu.dot_dimension_numbers<[1], [0], [0], [1], [0, 0, 1, 1], [], []>} : vector<16x32xbf16>, vector<32x128xbf16>, vector<16x128xf32> -> vector<16x128xf32>
    %7 = vector.extract_strided_slice %2 {offsets = [0, 0], sizes = [1, 128], strides = [1, 1]} : vector<3x128xf32> to vector<1x128xf32>
    %8 = vector.broadcast %7 : vector<1x128xf32> to vector<16x128xf32>
    %9 = arith.addf %6, %8 : vector<16x128xf32>
    %10 = vector.extract_strided_slice %2 {offsets = [1, 0], sizes = [1, 128], strides = [1, 1]} : vector<3x128xf32> to vector<1x128xf32>
    %11 = vector.extract_strided_slice %2 {offsets = [2, 0], sizes = [1, 128], strides = [1, 1]} : vector<3x128xf32> to vector<1x128xf32>
    %cst_9 = arith.constant dense<0.000000e+00> : vector<16xf32>
    %12 = vector.multi_reduction <add>, %9, %cst_9 [1] : vector<16x128xf32> to vector<16xf32>
    %13 = vector.shape_cast %12 : vector<16xf32> to vector<16x1xf32>
    %cst_10 = arith.constant 1.562500e-02 : f32
    %14 = vector.broadcast %cst_10 : f32 to vector<16x1xf32>
    %15 = arith.mulf %13, %14 : vector<16x1xf32>
    %16 = arith.mulf %9, %9 : vector<16x128xf32>
    %cst_11 = arith.constant dense<0.000000e+00> : vector<16xf32>
    %17 = vector.multi_reduction <add>, %16, %cst_11 [1] : vector<16x128xf32> to vector<16xf32>
    %18 = vector.shape_cast %17 : vector<16xf32> to vector<16x1xf32>
    %cst_12 = arith.constant 1.562500e-02 : f32
    %19 = vector.broadcast %cst_12 : f32 to vector<16x1xf32>
    %20 = arith.mulf %18, %19 : vector<16x1xf32>
    %21 = arith.mulf %15, %15 : vector<16x1xf32>
    %22 = arith.subf %20, %21 : vector<16x1xf32>
    %cst_13 = arith.constant 0.000000e+00 : f32
    %23 = vector.broadcast %cst_13 : f32 to vector<16x1xf32>
    %24 = arith.maximumf %22, %23 : vector<16x1xf32>
    %25 = vector.broadcast %15 : vector<16x1xf32> to vector<16x128xf32>
    %26 = arith.subf %9, %25 : vector<16x128xf32>
    %cst_14 = arith.constant 9.99999974E-6 : f32
    %27 = vector.broadcast %cst_14 : f32 to vector<16x1xf32>
    %28 = arith.addf %24, %27 : vector<16x1xf32>
    %29 = math.rsqrt %28 : vector<16x1xf32>
    %30 = vector.broadcast %29 : vector<16x1xf32> to vector<16x128xf32>
    %31 = arith.mulf %26, %30 : vector<16x128xf32>
    %32 = vector.broadcast %10 : vector<1x128xf32> to vector<16x128xf32>
    %33 = arith.mulf %31, %32 : vector<16x128xf32>
    %34 = vector.broadcast %11 : vector<1x128xf32> to vector<16x128xf32>
    %35 = arith.addf %33, %34 : vector<16x128xf32>
    %cst_15 = arith.constant 0.000000e+00 : f32
    %36 = vector.broadcast %cst_15 : f32 to vector<16x128xf32>
    %37 = arith.maximumf %35, %36 : vector<16x128xf32>
    %38 = arith.truncf %37 : vector<16x128xf32> to vector<16x128xbf16>
    %c0_16 = arith.constant 0 : index
    %c0_17 = arith.constant 0 : index
    %39 = vector.load %arg4[%c0_16, %c0_17] : memref<128x128xbf16, #tpu.memory_space<vmem>>, vector<128x128xbf16>
    %cst_18 = arith.constant dense<0.000000e+00> : vector<16x128xf32>
    %40 = tpu.matmul %38, %39, %cst_18 {dimension_numbers = #tpu.dot_dimension_numbers<[1], [0], [0], [1], [0, 0, 1, 1], [], []>} : vector<16x128xbf16>, vector<128x128xbf16>, vector<16x128xf32> -> vector<16x128xf32>
    %41 = vector.extract_strided_slice %3 {offsets = [0, 0], sizes = [1, 128], strides = [1, 1]} : vector<3x128xf32> to vector<1x128xf32>
    %42 = vector.broadcast %41 : vector<1x128xf32> to vector<16x128xf32>
    %43 = arith.addf %40, %42 : vector<16x128xf32>
    %44 = vector.extract_strided_slice %3 {offsets = [1, 0], sizes = [1, 128], strides = [1, 1]} : vector<3x128xf32> to vector<1x128xf32>
    %45 = vector.extract_strided_slice %3 {offsets = [2, 0], sizes = [1, 128], strides = [1, 1]} : vector<3x128xf32> to vector<1x128xf32>
    %cst_19 = arith.constant dense<0.000000e+00> : vector<16xf32>
    %46 = vector.multi_reduction <add>, %43, %cst_19 [1] : vector<16x128xf32> to vector<16xf32>
    %47 = vector.shape_cast %46 : vector<16xf32> to vector<16x1xf32>
    %cst_20 = arith.constant 1.562500e-02 : f32
    %48 = vector.broadcast %cst_20 : f32 to vector<16x1xf32>
    %49 = arith.mulf %47, %48 : vector<16x1xf32>
    %50 = arith.mulf %43, %43 : vector<16x128xf32>
    %cst_21 = arith.constant dense<0.000000e+00> : vector<16xf32>
    %51 = vector.multi_reduction <add>, %50, %cst_21 [1] : vector<16x128xf32> to vector<16xf32>
    %52 = vector.shape_cast %51 : vector<16xf32> to vector<16x1xf32>
    %cst_22 = arith.constant 1.562500e-02 : f32
    %53 = vector.broadcast %cst_22 : f32 to vector<16x1xf32>
    %54 = arith.mulf %52, %53 : vector<16x1xf32>
    %55 = arith.mulf %49, %49 : vector<16x1xf32>
    %56 = arith.subf %54, %55 : vector<16x1xf32>
    %cst_23 = arith.constant 0.000000e+00 : f32
    %57 = vector.broadcast %cst_23 : f32 to vector<16x1xf32>
    %58 = arith.maximumf %56, %57 : vector<16x1xf32>
    %59 = vector.broadcast %49 : vector<16x1xf32> to vector<16x128xf32>
    %60 = arith.subf %43, %59 : vector<16x128xf32>
    %cst_24 = arith.constant 9.99999974E-6 : f32
    %61 = vector.broadcast %cst_24 : f32 to vector<16x1xf32>
    %62 = arith.addf %58, %61 : vector<16x1xf32>
    %63 = math.rsqrt %62 : vector<16x1xf32>
    %64 = vector.broadcast %63 : vector<16x1xf32> to vector<16x128xf32>
    %65 = arith.mulf %60, %64 : vector<16x128xf32>
    %66 = vector.broadcast %44 : vector<1x128xf32> to vector<16x128xf32>
    %67 = arith.mulf %65, %66 : vector<16x128xf32>
    %68 = vector.broadcast %45 : vector<1x128xf32> to vector<16x128xf32>
    %69 = arith.addf %67, %68 : vector<16x128xf32>
    %cst_25 = arith.constant 0.000000e+00 : f32
    %70 = vector.broadcast %cst_25 : f32 to vector<16x128xf32>
    %71 = arith.maximumf %69, %70 : vector<16x128xf32>
    %72 = arith.truncf %71 : vector<16x128xf32> to vector<16x128xbf16>
    %c0_26 = arith.constant 0 : index
    %c0_27 = arith.constant 0 : index
    %73 = vector.load %arg6[%c0_26, %c0_27] : memref<128x128xbf16, #tpu.memory_space<vmem>>, vector<128x128xbf16>
    %cst_28 = arith.constant dense<0.000000e+00> : vector<16x128xf32>
    %74 = tpu.matmul %72, %73, %cst_28 {dimension_numbers = #tpu.dot_dimension_numbers<[1], [0], [0], [1], [0, 0, 1, 1], [], []>} : vector<16x128xbf16>, vector<128x128xbf16>, vector<16x128xf32> -> vector<16x128xf32>
    %75 = vector.broadcast %4 : vector<1x128xf32> to vector<16x128xf32>
    %76 = arith.addf %74, %75 : vector<16x128xf32>
    %77 = math.tanh %76 : vector<16x128xf32>
    %78 = arith.truncf %77 : vector<16x128xf32> to vector<16x128xbf16>
    %c0_29 = arith.constant 0 : index
    %c0_30 = arith.constant 0 : index
    %79 = vector.load %arg8[%c0_29, %c0_30] : memref<16x128xbf16, #tpu.memory_space<vmem>>, vector<16x128xbf16>
    tpu.vector_store %arg8[%c0_29, %c0_30], %78 {strides = array<i32>} : memref<16x128xbf16, #tpu.memory_space<vmem>>, vector<16x128xbf16>,
    return
  }
  func.func @transform_0(%arg0: i32) -> (i32, i32) {
    %c0_i32 = arith.constant 0 : i32
    %c0_i32_0 = arith.constant 0 : i32
    return %arg0, %c0_i32 : i32, i32
  }
  func.func @transform_1(%arg0: i32) -> (i32, i32) {
    %c0_i32 = arith.constant 0 : i32
    %c0_i32_0 = arith.constant 0 : i32
    %c0_i32_1 = arith.constant 0 : i32
    return %c0_i32, %c0_i32_0 : i32, i32
  }
  func.func @transform_2(%arg0: i32) -> (i32, i32) {
    %c0_i32 = arith.constant 0 : i32
    %c0_i32_0 = arith.constant 0 : i32
    %c0_i32_1 = arith.constant 0 : i32
    return %c0_i32, %c0_i32_0 : i32, i32
  }
  func.func @transform_3(%arg0: i32) -> (i32, i32) {
    %c0_i32 = arith.constant 0 : i32
    %c0_i32_0 = arith.constant 0 : i32
    %c0_i32_1 = arith.constant 0 : i32
    return %c0_i32, %c0_i32_0 : i32, i32
  }
  func.func @transform_4(%arg0: i32) -> (i32, i32) {
    %c0_i32 = arith.constant 0 : i32
    %c0_i32_0 = arith.constant 0 : i32
    %c0_i32_1 = arith.constant 0 : i32
    return %c0_i32, %c0_i32_0 : i32, i32
  }
  func.func @transform_5(%arg0: i32) -> (i32, i32) {
    %c0_i32 = arith.constant 0 : i32
    %c0_i32_0 = arith.constant 0 : i32
    %c0_i32_1 = arith.constant 0 : i32
    return %c0_i32, %c0_i32_0 : i32, i32
  }
  func.func @transform_6(%arg0: i32) -> (i32, i32) {
    %c0_i32 = arith.constant 0 : i32
    %c0_i32_0 = arith.constant 0 : i32
    %c0_i32_1 = arith.constant 0 : i32
    return %c0_i32, %c0_i32_0 : i32, i32
  }
  func.func @transform_7(%arg0: i32) -> (i32, i32) {
    %c0_i32 = arith.constant 0 : i32
    %c0_i32_0 = arith.constant 0 : i32
    return %arg0, %c0_i32 : i32, i32
  }
}

</mosaic_0001>

<bundles_post_ra>
// kernel: actor_net_forward.1
= control target key start
LH: loop header
LB: loop body
LE: loop exit
PB: predicated region body
PF: predicated region fallthrough
CT: control target
= control target key end

     0   :  { %12 = vsyncpa [#allocation3], 0  ;;  %s643_s0 = inlined_call_operand.vmem [shape: f32[16,32], index: 0, kind: input, shape index: {}]   ;;  %s644_s1 = inlined_call_operand.vmem [shape: bf16[32,128], index: 1, kind: input, shape index: {}]   ;;  %s645_s2 = inlined_call_operand.vmem [shape: f32[3,128], index: 2, kind: input, shape index: {}]   ;;  %s646_s3 = inlined_call_operand.hbm [shape: bf16[128,128], index: 3, kind: input, shape index: {}]   ;;  %s647_s4 = inlined_call_operand.vmem [shape: f32[3,128], index: 4, kind: input, shape index: {}]   ;;  %s648_s5 = inlined_call_operand.hbm [shape: bf16[128,128], index: 5, kind: input, shape index: {}]   ;;  %s649_s6 = inlined_call_operand.vmem [shape: f32[1,128], index: 6, kind: input, shape index: {}]   ;;  %s650_s7 = inlined_call_operand.vmem [shape: bf16[16,128], index: 7, kind: output, shape index: {}]  }
   0x1   :  { %s24_s26 = sshll.u32 %s646_s3, 4  ;;  %s25_s26 = int_to_ptr.hbm [resolvable:$true] %s24_s26 }
   0x2   :  { %13 = vsyncpa [#allocation5], 0  ;;  %s547_s27 = smov [#allocation2]   ;;  %s39_s8 = sshll.u32 %s648_s5, 4  ;;  %s40_s8 = int_to_ptr.hbm [resolvable:$true] %s39_s8 }
   0x3   :  { %s26_s28 = sshll.u32 %s547_s27, 4  ;;  %s548_s9 = smov 64   ;;  %s27_s28 = int_to_ptr.vmem [resolvable:$true] %s26_s28 }
   0x4   :  { %s549_s10 = smov 4   ;;  %s550_s11 = smov [#allocation4]  }
   0x5   :  { %32 = dma.hbm_to_vmem [thread:$0]  %s25_s26, 1024, %s27_s28, [#allocation3], %s548_s9, %s548_s9, %s549_s10  }
   0x6   :  { %s41_s12 = sshll.u32 %s550_s11, 4  ;;  %s42_s12 = int_to_ptr.vmem [resolvable:$true] %s41_s12 }
   0x7   :  { %47 = dma.hbm_to_vmem [thread:$0]  %s40_s8, 1024, %s42_s12, [#allocation5], %s548_s9, %s548_s9, %s549_s10  }
   0x8   :  { %543 = dma.done.wait [#allocation3], 1024  }
   0x9   :  { %544 = vsyncadd [#allocation3], 4294966272 }
   0xa   :  { %545 = dma.done.wait [#allocation5], 1024  }
   0xb   :  { %546 = vsyncadd [#allocation5], 4294966272  ;;  %v456_v0 = vld [vmem:[%s644_s1 + $0x8] sm:$0xff]  ;;  %v455_v1 = vld [vmem:[%s644_s1] sm:$0xff]  ;;  %vm82_vm0 = vcmask 261120  }
   0xc   :  { %92 = vmatpush.bf16.msra.mxu0 %v456_v0  ;;  %v59_v2 = vld [vmem:[%s643_s0] sm:$0xff]  ;;  %v60_v3 = vld [vmem:[%s643_s0 + $0x8] sm:$0xff]  ;;  %v464_v13 = vld [vmem:[#allocation2 + $0x38] sm:$0xff] }
   0xd   :  { %v61_v4 = vpack.c.bf16 %v60_v3, %v59_v2  ;;  %v612_v5 = vld [vmem:[%s645_s2] sm:$0x7]  ;;  %220 = vmatpush.bf16.msra.mxu1 %v464_v13  ;;  %v463_v14 = vld [vmem:[#allocation2 + $0x30] sm:$0xff]  ;;  %v462_v15 = vld [vmem:[#allocation2 + $0x28] sm:$0xff] }
   0xe   :  { %v69_v6 = vperm.slane %v612_v5, 0  ;;  %v461_v16 = vld [vmem:[#allocation2 + $0x20] sm:$0xff]  ;;  %v460_v17 = vld [vmem:[#allocation2 + $0x18] sm:$0xff]  ;;  %v459_v23 = vld [vmem:[#allocation2 + $0x10] sm:$0xff]  ;;  %v146_v49 = vperm.slane %v612_v5, 1  ;;  %v149_v55 = vperm.slane %v612_v5, 2 }
   0xf   :  { %v458_v25 = vld [vmem:[#allocation2 + $0x8] sm:$0xff]  ;;  %v457_v30 = vld [vmem:[#allocation2] sm:$0xff] }
  0x10   :  { %93 = vmatpush.bf16.msra.mxu0 %v455_v1  ;;  %v626_v0 = vld [vmem:[%s647_s4] sm:$0x7] }
  0x11   :  { %221 = vmatpush.bf16.msra.mxu1 %v463_v14  ;;  %v171_v1 = vperm.slane %v626_v0, 0 }
  0x13   :  { %390 = vmatmul.msk.bf16.vlgmr.msra.gmra.mxu0 %vm82_vm0, %v61_v4 }
  0x15   :  { %222 = vmatpush.bf16.msra.mxu1 %v462_v15 }
  0x19   :  { %223 = vmatpush.bf16.msra.mxu1 %v461_v16 }
  0x1d   :  { %224 = vmatpush.bf16.msra.mxu1 %v460_v17 }
  0x21   :  { %225 = vmatpush.bf16.msra.mxu1 %v459_v23 }
  0x25   :  { %226 = vmatpush.bf16.msra.mxu1 %v458_v25  ;;  %v465_v25 = vld [vmem:[#allocation4] sm:$0xff] }
  0x29   :  { %227 = vmatpush.bf16.msra.mxu1 %v457_v30 }
  0x90   :  { %v95_v7 = vpop.f32.mrf.mxu0 }
  0x91   :  { %v96_v8 = vadd.f32 %v95_v7, %v69_v6 }
  0x93   :  { %100 = vadd.xlane.f32.xlu0 %v96_v8  ;;  %v106_v9 = vmul.f32 %v96_v8, %v96_v8 }
  0x95   :  { %108 = vadd.xlane.f32.xlu1 %v106_v9  ;;  %v471_v9 = vld [vmem:[#allocation4 + $0x30] sm:$0xff] }
  0x98   :  { %v97_v10 = vpop.f32.mrf.mxu0 }
  0x99   :  { %v615_v11 = vadd.f32 %v97_v10, %v69_v6  ;;  %v470_v10 = vld [vmem:[#allocation4 + $0x28] sm:$0xff] }
  0x9b   :  { %102 = vadd.xlane.f32.xlu0 %v615_v11  ;;  %v107_v12 = vmul.f32 %v615_v11, %v615_v11 }
  0x9d   :  { %110 = vadd.xlane.f32.xlu1 %v107_v12  ;;  %v468_v12 = vld [vmem:[#allocation4 + $0x18] sm:$0xff] }
 0x106   :  { %v101_v18 = vpop.xlane.xlu0 %100 }
 0x107   :  { %v104_v19 = vmul.f32 0.015625, %v101_v18  ;;  %v467_v18 = vld [vmem:[#allocation4 + $0x10] sm:$0xff] }
 0x108   :  { %v109_v20 = vpop.xlane.xlu1 %108 }
 0x109   :  { %v114_v21 = vmul.f32 %v104_v19, %v104_v19  ;;  %v112_v22 = vmul.f32 0.015625, %v109_v20  ;;  %v120_v47 = vsub.f32 %v96_v8, %v104_v19  ;;  %v472_v8 = vld [vmem:[#allocation4 + $0x38] sm:$0xff]  ;;  %v466_v20 = vld [vmem:[#allocation4 + $0x8] sm:$0xff] }
 0x10a   :  { %356 = vmatpush.bf16.msra.mxu2 %v472_v8 }
 0x10b   :  { %v116_v24 = vsub.f32 %v112_v22, %v114_v21 }
 0x10d   :  { %v118_v26 = vmax.f32 %v116_v24, 0.0 }
 0x10e   :  { %v103_v27 = vpop.xlane.xlu0 %102  ;;  %357 = vmatpush.bf16.msra.mxu2 %v471_v9 }
 0x10f   :  { %v122_v28 = vadd.f32 1e-05, %v118_v26  ;;  %v105_v29 = vmul.f32 0.015625, %v103_v27 }
 0x110   :  { %v111_v31 = vpop.xlane.xlu1 %110 }
 0x111   :  { %483 = vrsqrt.f32 %v122_v28  ;;  %v115_v32 = vmul.f32 %v105_v29, %v105_v29  ;;  %v113_v33 = vmul.f32 0.015625, %v111_v31  ;;  %vm130_vm2 = vweird.f32 %v122_v28 }
 0x112   :  { %v121_v53 = vsub.f32 %v615_v11, %v105_v29  ;;  %358 = vmatpush.bf16.msra.mxu2 %v470_v10  ;;  %v469_v11 = vld [vmem:[#allocation4 + $0x20] sm:$0xff] }
 0x113   :  { %v117_v34 = vsub.f32 %v113_v33, %v115_v32 }
 0x115   :  { %v119_v35 = vmax.f32 %v117_v34, 0.0 }
 0x116   :  { %359 = vmatpush.bf16.msra.mxu2 %v469_v11 }
 0x117   :  { %v484_v36 = vpop.eup %483  ;;  %v123_v38 = vadd.f32 1e-05, %v119_v35 }
 0x118   :  { %v125_v37 = vmul.f32 %v484_v36, %v122_v28  ;;  %vm131_vm1 = vweird.f32 %v484_v36 }
 0x119   :  { %485 = vrsqrt.f32 %v123_v38  ;;  %vm132_vm3 = vmor %vm130_vm2, %vm131_vm1  ;;  %vm140_vm5 = vweird.f32 %v123_v38 }
 0x11a   :  { %v126_v39 = vmul.f32 %v484_v36, %v125_v37  ;;  %360 = vmatpush.bf16.msra.mxu2 %v468_v12 }
 0x11c   :  { %v127_v40 = vmul.f32 0.5, %v126_v39 }
 0x11e   :  { %v128_v41 = vsub.f32 1.5, %v127_v40  ;;  %361 = vmatpush.bf16.msra.mxu2 %v467_v18 }
 0x11f   :  { %v486_v42 = vpop.eup %485 }
 0x120   :  { %v129_v43 = vmul.f32 %v484_v36, %v128_v41  ;;  %v135_v44 = vmul.f32 %v486_v42, %v123_v38  ;;  %vm141_vm4 = vweird.f32 %v486_v42 }
 0x121   :  { %vm142_vm6 = vmor %vm140_vm5, %vm141_vm4 }
 0x122   :  { %v136_v45 = vmul.f32 %v486_v42, %v135_v44  ;;  %v133_v46 = vsel %vm132_vm3, %v484_v36, %v129_v43  ;;  %362 = vmatpush.bf16.msra.mxu2 %v466_v20  ;;  %v280_v44 = vperm.slane %v626_v0, 1 }
 0x123   :  { %v144_v50 = vmul.f32 %v133_v46, %v120_v47 }
 0x124   :  { %v137_v48 = vmul.f32 0.5, %v136_v45 }
 0x125   :  { %v147_v54 = vmul.f32 %v146_v49, %v144_v50  ;;  %v283_v50 = vperm.slane %v626_v0, 2 }
 0x126   :  { %v138_v51 = vsub.f32 1.5, %v137_v48  ;;  %363 = vmatpush.bf16.msra.mxu2 %v465_v25 }
 0x127   :  { %v150_v59 = vadd.f32 %v149_v55, %v147_v54 }
 0x128   :  { %v139_v52 = vmul.f32 %v486_v42, %v138_v51 }
 0x129   :  { %v152_v61 = vmax.f32 %v150_v59, 0.0 }
 0x12a   :  { %v143_v56 = vsel %vm142_vm6, %v486_v42, %v139_v52 }
 0x12b   :  { %v145_v57 = vmul.f32 %v143_v56, %v121_v53 }
 0x12d   :  { %v148_v58 = vmul.f32 %v146_v49, %v145_v57 }
 0x12f   :  { %v151_v60 = vadd.f32 %v149_v55, %v148_v58 }
 0x131   :  { %v153_v62 = vmax.f32 %v151_v60, 0.0  ;;  %v482_v60 = vld [vmem:[%s649_s6] ss:$0 sm:$0xff] }
 0x133   :  { %v154_v63 = vpack.c.bf16 %v153_v62, %v152_v61 }
 0x135   :  { %228 = vmatmul.bf16.vlgmr.msra.gmra.mxu1 %v154_v63 }
 0x1b2   :  { %v229_v2 = vpop.f32.mrf.mxu1 }
 0x1b3   :  { %v230_v3 = vadd.f32 %v229_v2, %v171_v1 }
 0x1b5   :  { %234 = vadd.xlane.f32.xlu2 %v230_v3  ;;  %v240_v4 = vmul.f32 %v230_v3, %v230_v3 }
 0x1b7   :  { %242 = vadd.xlane.f32.xlu0 %v240_v4 }
 0x1ba   :  { %v231_v5 = vpop.f32.mrf.mxu1 }
 0x1bb   :  { %v629_v6 = vadd.f32 %v231_v5, %v171_v1 }
 0x1bd   :  { %236 = vadd.xlane.f32.xlu2 %v629_v6  ;;  %v241_v7 = vmul.f32 %v629_v6, %v629_v6 }
 0x1bf   :  { %244 = vadd.xlane.f32.xlu1 %v241_v7 }
 0x228   :  { %v235_v13 = vpop.xlane.xlu2 %234 }
 0x229   :  { %v238_v14 = vmul.f32 0.015625, %v235_v13 }
 0x22a   :  { %v243_v15 = vpop.xlane.xlu0 %242 }
 0x22b   :  { %v248_v16 = vmul.f32 %v238_v14, %v238_v14  ;;  %v246_v17 = vmul.f32 0.015625, %v243_v15  ;;  %v254_v42 = vsub.f32 %v230_v3, %v238_v14 }
 0x22d   :  { %v250_v19 = vsub.f32 %v246_v17, %v248_v16 }
 0x22f   :  { %v252_v21 = vmax.f32 %v250_v19, 0.0 }
 0x230   :  { %v237_v22 = vpop.xlane.xlu2 %236 }
 0x231   :  { %v256_v23 = vadd.f32 1e-05, %v252_v21  ;;  %v239_v24 = vmul.f32 0.015625, %v237_v22 }
 0x232   :  { %v245_v26 = vpop.xlane.xlu1 %244 }
 0x233   :  { %487 = vrsqrt.f32 %v256_v23  ;;  %v249_v27 = vmul.f32 %v239_v24, %v239_v24  ;;  %v247_v28 = vmul.f32 0.015625, %v245_v26  ;;  %vm264_vm8 = vweird.f32 %v256_v23 }
 0x234   :  { %v255_v48 = vsub.f32 %v629_v6, %v239_v24 }
 0x235   :  { %v251_v29 = vsub.f32 %v247_v28, %v249_v27 }
 0x237   :  { %v253_v30 = vmax.f32 %v251_v29, 0.0 }
 0x239   :  { %v488_v31 = vpop.eup %487  ;;  %v257_v33 = vadd.f32 1e-05, %v253_v30 }
 0x23a   :  { %v259_v32 = vmul.f32 %v488_v31, %v256_v23  ;;  %vm265_vm7 = vweird.f32 %v488_v31 }
 0x23b   :  { %489 = vrsqrt.f32 %v257_v33  ;;  %vm266_vm9 = vmor %vm264_vm8, %vm265_vm7  ;;  %vm274_vm11 = vweird.f32 %v257_v33 }
 0x23c   :  { %v260_v34 = vmul.f32 %v488_v31, %v259_v32 }
 0x23e   :  { %v261_v35 = vmul.f32 0.5, %v260_v34 }
 0x240   :  { %v262_v36 = vsub.f32 1.5, %v261_v35 }
 0x241   :  { %v490_v37 = vpop.eup %489 }
 0x242   :  { %v263_v38 = vmul.f32 %v488_v31, %v262_v36  ;;  %v269_v39 = vmul.f32 %v490_v37, %v257_v33  ;;  %vm275_vm10 = vweird.f32 %v490_v37 }
 0x243   :  { %vm276_vm12 = vmor %vm274_vm11, %vm275_vm10 }
 0x244   :  { %v270_v40 = vmul.f32 %v490_v37, %v269_v39  ;;  %v267_v41 = vsel %vm266_vm9, %v488_v31, %v263_v38 }
 0x245   :  { %v278_v45 = vmul.f32 %v267_v41, %v254_v42 }
 0x246   :  { %v271_v43 = vmul.f32 0.5, %v270_v40 }
 0x247   :  { %v281_v49 = vmul.f32 %v280_v44, %v278_v45 }
 0x248   :  { %v272_v46 = vsub.f32 1.5, %v271_v43 }
 0x249   :  { %v284_v54 = vadd.f32 %v283_v50, %v281_v49 }
 0x24a   :  { %v273_v47 = vmul.f32 %v490_v37, %v272_v46 }
 0x24b   :  { %v286_v56 = vmax.f32 %v284_v54, 0.0 }
 0x24c   :  { %v277_v51 = vsel %vm276_vm12, %v490_v37, %v273_v47 }
 0x24d   :  { %v279_v52 = vmul.f32 %v277_v51, %v255_v48 }
 0x24f   :  { %v282_v53 = vmul.f32 %v280_v44, %v279_v52 }
 0x251   :  { %v285_v55 = vadd.f32 %v283_v50, %v282_v53 }
 0x253   :  { %v287_v57 = vmax.f32 %v285_v55, 0.0 }
 0x255   :  { %v288_v58 = vpack.c.bf16 %v287_v57, %v286_v56 }
 0x257   :  { %364 = vmatmul.bf16.vlgmr.msra.gmra.mxu2 %v288_v58 }
 0x2da   :  { %v365_v59 = vpop.f32.mrf.mxu2 }
 0x2db   :  { %v366_v61 = vadd.f32 %v482_v60, %v365_v59 }
 0x2dd   :  { %491 = vtanh.f32 %v366_v61 }
 0x2e2   :  { %v367_v62 = vpop.f32.mrf.mxu2 }
 0x2e3   :  { %v368_v63 = vadd.f32 %v482_v60, %v367_v62  ;;  %v492_v0 = vpop.eup %491 }
 0x2e5   :  { %493 = vtanh.f32 %v368_v63 }
 0x2eb   :  { %v494_v1 = vpop.eup %493 }
 0x2ec   :  { %v476_v2 = vpack.c.bf16 %v494_v1, %v492_v0 }
 0x2ee   :  { %477 = vst [vmem:[%s650_s7] sm:$0xff] %v476_v2  }
 0x2ef   :  { %380 = vsyncpa [#allocation3], 1 }
 0x2f0   :  { %381 = vsyncpa [#allocation5], 1 }

</bundles_post_ra>
